<compile_context>
chip_gen: v7x
topology: tpu7x:2x2x1
jax: 0.10.0
libtpu: 0.0.40
codegen_flags: <defaults>
</compile_context>

<pallas_src>
import functools

import numpy as np
import jax
import jax.numpy as jnp
from jax import lax
from jax.experimental import pallas as pl
from jax.experimental.pallas import tpu as pltpu

EPS = 1e-5
_VMEM_LIMIT = 32 * 1024 * 1024   # explicit scoped-VMEM limit (headroom on v7x's 64 MiB)


def _banded_weights(w_hwio, W):
    """(3, 3, Ci, Co) HWIO conv weights -> (3, W*Ci, W*Co) banded matrices.

    B_ky[wi*Ci + ci, wo*Co + co] = w[ky, wi - wo + 1, ci, co] if |wi - wo| <= 1
    else 0.  Width zero-padding is implicit (out-of-range wi simply absent).
    Host-side, tiny (W <= a few hundred).
    """
    w = np.asarray(w_hwio, np.float32)
    KH, KW, Ci, Co = w.shape
    b = np.zeros((KH, W, Ci, W, Co), np.float32)
    for ky in range(KH):
        for kx in range(KW):
            dx = kx - 1
            for wo in range(W):
                wi = wo + dx
                if 0 <= wi < W:
                    b[ky, wi, :, wo, :] = w[ky, kx]
    return jnp.asarray(b.reshape(KH, W * Ci, W * Co))


def _conv_stats_kernel(top_ref, x_ref, bot_ref, w_ref, sc_ref, sh_ref,
                       y_ref, st_ref, xp_scr, *, TH, WCI, WCO, pre_act):
    """One row tile: [optional fused BN+ReLU on input] -> 3x3 conv -> stats."""
    t = pl.program_id(1)
    HT = pl.num_programs(1)

    def prep(v):                      # fused pre-activation (stage 2 only)
        v = v.astype(jnp.float32)
        if pre_act:
            v = jnp.maximum(v * sc_ref[0, :] + sh_ref[0, :], 0.0)
        return v

    # Assemble the height-haloed tile (TH+2, WCI) in VMEM scratch.  Halo rows
    # are real neighbour rows inside the image, zeros at image borders
    # (mask-multiply -> zero padding in activation space).
    xp_scr[0:1, :] = prep(top_ref[7:8, :]) * (t > 0).astype(jnp.float32)
    xp_scr[1:TH + 1, :] = prep(x_ref[...])
    xp_scr[TH + 1:TH + 2, :] = (prep(bot_ref[0:1, :])
                                * (t < HT - 1).astype(jnp.float32))
    xp = xp_scr[...]                                   # (TH+2, WCI)

    # 3x3 conv == 3 banded matmuls (kx taps + W zero-padding folded into w_ref[ky]).
    acc = jnp.dot(xp[0:TH, :], w_ref[0], preferred_element_type=jnp.float32)
    acc = acc + jnp.dot(xp[1:TH + 1, :], w_ref[1],
                        preferred_element_type=jnp.float32)
    acc = acc + jnp.dot(xp[2:TH + 2, :], w_ref[2],
                        preferred_element_type=jnp.float32)
    # NOTE: conv bias intentionally omitted — it cancels exactly under the
    # batch-statistics BatchNorm that follows.

    y_ref[...] = acc.astype(y_ref.dtype)

    # Per-tile partial BatchNorm statistics (per lane; the W-fold to per-channel
    # happens in cheap JAX glue).  Row 0 = sum, row 1 = sum of squares.
    st_ref[...] = jnp.zeros_like(st_ref)
    st_ref[0:1, :] = jnp.sum(acc, axis=0, keepdims=True)
    st_ref[1:2, :] = jnp.sum(acc * acc, axis=0, keepdims=True)


def _conv_stats_stage(x2d, w_banded, pre_scale, pre_shift, *,
                      N, H, TH, WCI, WCO, pre_act):
    """Row-tiled conv stage.  x2d: (N*H, WCI) lane-flattened activations."""
    HT = H // TH
    H8, TH8, NH8 = H // 8, TH // 8, (N * H) // 8

    kern = functools.partial(_conv_stats_kernel,
                             TH=TH, WCI=WCI, WCO=WCO, pre_act=pre_act)

    # Same array passed three times: 8-row blocks that contain the halo row
    # above / the tile itself / the halo row below.  Index maps clamp at the
    # array ends; the kernel masks out-of-image halo rows to zero.
    top_spec = pl.BlockSpec(
        (8, WCI), lambda n, t: (jnp.maximum(n * H8 + t * TH8 - 1, 0), 0))
    ctr_spec = pl.BlockSpec((TH, WCI), lambda n, t: (n * HT + t, 0))
    bot_spec = pl.BlockSpec(
        (8, WCI),
        lambda n, t: (jnp.minimum(n * H8 + (t + 1) * TH8, NH8 - 1), 0))
    w_spec = pl.BlockSpec((3, WCI, WCO), lambda n, t: (0, 0, 0))
    vec_spec = pl.BlockSpec((1, WCI), lambda n, t: (0, 0))

    y, stats = pl.pallas_call(
        kern,
        out_shape=(jax.ShapeDtypeStruct((N * H, WCO), jnp.float32),
                   jax.ShapeDtypeStruct((N, HT, 8, WCO), jnp.float32)),
        grid=(N, HT),
        in_specs=[top_spec, ctr_spec, bot_spec, w_spec, vec_spec, vec_spec],
        out_specs=(pl.BlockSpec((TH, WCO), lambda n, t: (n * HT + t, 0)),
                   pl.BlockSpec((None, None, 8, WCO),
                                lambda n, t: (n, t, 0, 0))),
        scratch_shapes=[pltpu.VMEM((TH + 2, WCI), jnp.float32)],
        compiler_params=pltpu.CompilerParams(
            dimension_semantics=("parallel", "parallel"),
            vmem_limit_bytes=_VMEM_LIMIT),
    )(x2d, x2d, x2d, w_banded, pre_scale, pre_shift)
    return y, stats


def _bn_scale_shift(stats, gamma, beta, count, W, C):
    """Fold partial (sum, sumsq) into a per-lane affine: y*scale + shift."""
    ssum = stats[:, :, 0, :].sum(axis=(0, 1)).reshape(W, C).sum(axis=0)
    ssq = stats[:, :, 1, :].sum(axis=(0, 1)).reshape(W, C).sum(axis=0)
    mean = ssum / count
    var = ssq / count - mean * mean            # biased variance (torch training)
    scale = gamma * lax.rsqrt(var + EPS)
    shift = beta - mean * scale
    # broadcast the per-channel affine to the lane layout (lane = w*C + c)
    return (jnp.tile(scale, W).reshape(1, W * C),
            jnp.tile(shift, W).reshape(1, W * C))


def _bn_relu_kernel(y_ref, sc_ref, sh_ref, o_ref):
    o_ref[...] = jnp.maximum(
        y_ref[...].astype(jnp.float32) * sc_ref[0, :] + sh_ref[0, :],
        0.0).astype(o_ref.dtype)


def _bn_relu(y2d, scale_l, shift_l, *, TR):
    NROW, WCO = y2d.shape
    return pl.pallas_call(
        _bn_relu_kernel,
        out_shape=jax.ShapeDtypeStruct((NROW, WCO), jnp.float32),
        grid=(NROW // TR,),
        in_specs=[pl.BlockSpec((TR, WCO), lambda i: (i, 0)),
                  pl.BlockSpec((1, WCO), lambda i: (0, 0)),
                  pl.BlockSpec((1, WCO), lambda i: (0, 0))],
        out_specs=pl.BlockSpec((TR, WCO), lambda i: (i, 0)),
        compiler_params=pltpu.CompilerParams(
            dimension_semantics=("parallel",),
            vmem_limit_bytes=_VMEM_LIMIT),
    )(y2d, scale_l, shift_l)


def double_conv_forward(x_nchw, params, *, row_tile=8):
    """params = (w1, b1, g1, be1, w2, b2, g2, be2); conv weights HWIO.

    Matches nn.Sequential(Conv3x3, BN, ReLU, Conv3x3, BN, ReLU) with
    BatchNorm2d in training mode (batch statistics, biased variance).
    """
    w1, b1, g1, be1, w2, b2, g2, be2 = params
    del b1, b2   # conv biases cancel exactly under batch-statistics BatchNorm
    N, Cin, H, W = x_nchw.shape
    Cout = w1.shape[-1]
    assert H % row_tile == 0 and row_tile % 8 == 0

    # NCHW -> NHWC -> lane-flattened (N*H, W*C).  f32 storage keeps agreement
    # with the f32 reference; on v6e/v7x the two activation tensors (x2d, y1,
    # y2) can be stored bf16 (keep f32 accumulation) for half the HBM traffic.
    x2d = jnp.transpose(x_nchw, (0, 2, 3, 1)).astype(jnp.float32)
    x2d = x2d.reshape(N * H, W * Cin)

    wb1 = _banded_weights(w1, W)          # (3, W*Cin,  W*Cout)
    wb2 = _banded_weights(w2, W)          # (3, W*Cout, W*Cout)

    one = jnp.ones((1, W * Cin), jnp.float32)     # unused (pre_act=False)
    zero = jnp.zeros((1, W * Cin), jnp.float32)

    # stage 1: conv1 + per-tile BN1 partial statistics
    y1, st1 = _conv_stats_stage(x2d, wb1, one, zero, N=N, H=H, TH=row_tile,
                                WCI=W * Cin, WCO=W * Cout, pre_act=False)
    sc1, sh1 = _bn_scale_shift(st1, g1, be1, N * H * W, W, Cout)

    # stage 2: fused BN1+ReLU (input path) + conv2 + BN2 partial statistics
    y2, st2 = _conv_stats_stage(y1, wb2, sc1, sh1, N=N, H=H, TH=row_tile,
                                WCI=W * Cout, WCO=W * Cout, pre_act=True)
    sc2, sh2 = _bn_scale_shift(st2, g2, be2, N * H * W, W, Cout)

    # stage 3: final BN2 + ReLU (lane-dense elementwise)
    out2d = _bn_relu(y2, sc2, sh2, TR=row_tile)

    out = out2d.reshape(N, H, W, Cout)
    return jnp.transpose(out, (0, 3, 1, 2))       # NHWC -> NCHW


def ref_double_conv(x_nchw, params):
    """Pure-JAX reference (lax conv + batch-stat BN + ReLU), for verification."""
    w1, b1, g1, be1, w2, b2, g2, be2 = params

    def stage(x, w, b, g, be):
        y = lax.conv_general_dilated(
            x, w, window_strides=(1, 1), padding="SAME",
            dimension_numbers=("NHWC", "HWIO", "NHWC"))
        y = y + b
        mean = jnp.mean(y, axis=(0, 1, 2), keepdims=True)
        var = jnp.var(y, axis=(0, 1, 2), keepdims=True)
        y = (y - mean) / jnp.sqrt(var + EPS) * g + be
        return jnp.maximum(y, 0.0)

    x = jnp.transpose(x_nchw, (0, 2, 3, 1)).astype(jnp.float32)
    y = stage(x, w1, b1, g1, be1)
    y = stage(y, w2, b2, g2, be2)
    return jnp.transpose(y, (0, 3, 1, 2))


if __name__ == "__main__":
    in_ch, out_ch = 4, 8
    N, H, W = 2, 16, 16

    key = jax.random.PRNGKey(0)
    k_x, k_w1, k_b1, k_w2, k_b2 = jax.random.split(key, 5)

    x = jax.random.normal(k_x, (N, in_ch, H, W), jnp.float32)     # NCHW input

    # Deterministic parameter init (shapes per nn.Conv2d / nn.BatchNorm2d).
    w1 = 0.1 * jax.random.normal(k_w1, (3, 3, in_ch, out_ch), jnp.float32)
    b1 = 0.1 * jax.random.normal(k_b1, (out_ch,), jnp.float32)
    w2 = 0.1 * jax.random.normal(k_w2, (3, 3, out_ch, out_ch), jnp.float32)
    b2 = 0.1 * jax.random.normal(k_b2, (out_ch,), jnp.float32)
    g1 = jnp.ones((out_ch,), jnp.float32)     # BatchNorm gamma (torch init)
    be1 = jnp.zeros((out_ch,), jnp.float32)   # BatchNorm beta
    g2 = jnp.ones((out_ch,), jnp.float32)
    be2 = jnp.zeros((out_ch,), jnp.float32)

    params = (w1, b1, g1, be1, w2, b2, g2, be2)

    out = jax.block_until_ready(double_conv_forward(x, params))
    ref = jax.block_until_ready(ref_double_conv(x, params))

    assert out.shape == (N, out_ch, H, W)
    # f32 path typically agrees to ~1e-6; tolerance leaves margin for MXU
    # f32-matmul precision modes while still catching any indexing/layout bug.
    err = float(jnp.max(jnp.abs(out - ref)))
    assert err < 1e-3, f"max abs err {err}"

    print("KERNEL_OK")
</pallas_src>

<mosaic_0001>
module attributes {stable_mosaic.version = 11 : i64} {
  func.func @_conv_stats_kernel(%arg0: i32, %arg1: i32, %arg2: memref<8x64xf32, #tpu.memory_space<vmem>>, %arg3: memref<8x64xf32, #tpu.memory_space<vmem>>, %arg4: memref<8x64xf32, #tpu.memory_space<vmem>>, %arg5: memref<3x64x128xf32, #tpu.memory_space<vmem>>, %arg6: memref<1x64xf32, #tpu.memory_space<vmem>>, %arg7: memref<1x64xf32, #tpu.memory_space<vmem>>, %arg8: memref<8x128xf32, #tpu.memory_space<vmem>>, %arg9: memref<1x1x8x128xf32, #tpu.memory_space<vmem>>, %arg10: memref<10x64xf32, #tpu.memory_space<vmem>>) attributes {dimension_semantics = [#tpu.dimension_semantics<parallel>, #tpu.dimension_semantics<parallel>], iteration_bounds = array<i64: 2, 2>, scalar_prefetch = 0 : i64, scratch_operands = 1 : i64, tpu.core_type = #tpu.core_type<tc>, window_params = [{transform_indices = @transform_0, window_bounds = array<i64: 8, 64>}, {transform_indices = @transform_1, window_bounds = array<i64: 8, 64>}, {transform_indices = @transform_2, window_bounds = array<i64: 8, 64>}, {pipeline_mode = #tpu.pipeline_mode<synchronous>, transform_indices = @transform_3, window_bounds = array<i64: 3, 64, 128>}, {pipeline_mode = #tpu.pipeline_mode<synchronous>, transform_indices = @transform_4, window_bounds = array<i64: 1, 64>}, {pipeline_mode = #tpu.pipeline_mode<synchronous>, transform_indices = @transform_5, window_bounds = array<i64: 1, 64>}, {transform_indices = @transform_6, window_bounds = array<i64: 8, 128>}, {transform_indices = @transform_7, window_bounds = array<i64: 1, 1, 8, 128>}]} {
    %c7 = arith.constant 7 : index
    %c0 = arith.constant 0 : index
    %0 = vector.load %arg2[%c7, %c0] : memref<8x64xf32, #tpu.memory_space<vmem>>, vector<1x64xf32>
    %c0_i32 = arith.constant 0 : i32
    %1 = arith.cmpi sgt, %arg1, %c0_i32 : i32
    %2 = arith.extui %1 : i1 to i32
    %3 = arith.sitofp %2 : i32 to f32
    %4 = vector.broadcast %3 : f32 to vector<1x64xf32>
    %5 = arith.mulf %0, %4 : vector<1x64xf32>
    %c0_0 = arith.constant 0 : index
    %c0_1 = arith.constant 0 : index
    %6 = vector.load %arg10[%c0_0, %c0_1] : memref<10x64xf32, #tpu.memory_space<vmem>>, vector<1x64xf32>
    tpu.vector_store %arg10[%c0_0, %c0_1], %5 {strides = array<i32>} : memref<10x64xf32, #tpu.memory_space<vmem>>, vector<1x64xf32>,
    %c0_2 = arith.constant 0 : index
    %c0_3 = arith.constant 0 : index
    %7 = vector.load %arg3[%c0_2, %c0_3] : memref<8x64xf32, #tpu.memory_space<vmem>>, vector<8x64xf32>
    %c1 = arith.constant 1 : index
    %c0_4 = arith.constant 0 : index
    %8 = vector.load %arg10[%c1, %c0_4] : memref<10x64xf32, #tpu.memory_space<vmem>>, vector<8x64xf32>
    tpu.vector_store %arg10[%c1, %c0_4], %7 {strides = array<i32>} : memref<10x64xf32, #tpu.memory_space<vmem>>, vector<8x64xf32>,
    %c0_5 = arith.constant 0 : index
    %c0_6 = arith.constant 0 : index
    %9 = vector.load %arg4[%c0_5, %c0_6] : memref<8x64xf32, #tpu.memory_space<vmem>>, vector<1x64xf32>
    %c1_i32 = arith.constant 1 : i32
    %10 = arith.cmpi slt, %arg1, %c1_i32 : i32
    %11 = arith.extui %10 : i1 to i32
    %12 = arith.sitofp %11 : i32 to f32
    %13 = vector.broadcast %12 : f32 to vector<1x64xf32>
    %14 = arith.mulf %9, %13 : vector<1x64xf32>
    %c9 = arith.constant 9 : index
    %c0_7 = arith.constant 0 : index
    %15 = vector.load %arg10[%c9, %c0_7] : memref<10x64xf32, #tpu.memory_space<vmem>>, vector<1x64xf32>
    tpu.vector_store %arg10[%c9, %c0_7], %14 {strides = array<i32>} : memref<10x64xf32, #tpu.memory_space<vmem>>, vector<1x64xf32>,
    %c0_8 = arith.constant 0 : index
    %c0_9 = arith.constant 0 : index
    %16 = vector.load %arg10[%c0_8, %c0_9] : memref<10x64xf32, #tpu.memory_space<vmem>>, vector<10x64xf32>
    %17 = vector.extract_strided_slice %16 {offsets = [0, 0], sizes = [8, 64], strides = [1, 1]} : vector<10x64xf32> to vector<8x64xf32>
    %c0_10 = arith.constant 0 : index
    %c0_11 = arith.constant 0 : index
    %c0_12 = arith.constant 0 : index
    %18 = vector.load %arg5[%c0_10, %c0_11, %c0_12] : memref<3x64x128xf32, #tpu.memory_space<vmem>>, vector<1x64x128xf32>
    %19 = vector.shape_cast %18 : vector<1x64x128xf32> to vector<64x128xf32>
    %cst = arith.constant dense<0.000000e+00> : vector<8x128xf32>
    %20 = tpu.matmul %17, %19, %cst {dimension_numbers = #tpu.dot_dimension_numbers<[1], [0], [0], [1], [0, 0, 1, 1], [], []>} : vector<8x64xf32>, vector<64x128xf32>, vector<8x128xf32> -> vector<8x128xf32>
    %21 = vector.extract_strided_slice %16 {offsets = [1, 0], sizes = [8, 64], strides = [1, 1]} : vector<10x64xf32> to vector<8x64xf32>
    %c1_13 = arith.constant 1 : index
    %c0_14 = arith.constant 0 : index
    %c0_15 = arith.constant 0 : index
    %22 = vector.load %arg5[%c1_13, %c0_14, %c0_15] : memref<3x64x128xf32, #tpu.memory_space<vmem>>, vector<1x64x128xf32>
    %23 = vector.shape_cast %22 : vector<1x64x128xf32> to vector<64x128xf32>
    %cst_16 = arith.constant dense<0.000000e+00> : vector<8x128xf32>
    %24 = tpu.matmul %21, %23, %cst_16 {dimension_numbers = #tpu.dot_dimension_numbers<[1], [0], [0], [1], [0, 0, 1, 1], [], []>} : vector<8x64xf32>, vector<64x128xf32>, vector<8x128xf32> -> vector<8x128xf32>
    %25 = arith.addf %20, %24 : vector<8x128xf32>
    %26 = vector.extract_strided_slice %16 {offsets = [2, 0], sizes = [8, 64], strides = [1, 1]} : vector<10x64xf32> to vector<8x64xf32>
    %c2 = arith.constant 2 : index
    %c0_17 = arith.constant 0 : index
    %c0_18 = arith.constant 0 : index
    %27 = vector.load %arg5[%c2, %c0_17, %c0_18] : memref<3x64x128xf32, #tpu.memory_space<vmem>>, vector<1x64x128xf32>
    %28 = vector.shape_cast %27 : vector<1x64x128xf32> to vector<64x128xf32>
    %cst_19 = arith.constant dense<0.000000e+00> : vector<8x128xf32>
    %29 = tpu.matmul %26, %28, %cst_19 {dimension_numbers = #tpu.dot_dimension_numbers<[1], [0], [0], [1], [0, 0, 1, 1], [], []>} : vector<8x64xf32>, vector<64x128xf32>, vector<8x128xf32> -> vector<8x128xf32>
    %30 = arith.addf %25, %29 : vector<8x128xf32>
    %c0_20 = arith.constant 0 : index
    %c0_21 = arith.constant 0 : index
    %31 = vector.load %arg8[%c0_20, %c0_21] : memref<8x128xf32, #tpu.memory_space<vmem>>, vector<8x128xf32>
    tpu.vector_store %arg8[%c0_20, %c0_21], %30 {strides = array<i32>} : memref<8x128xf32, #tpu.memory_space<vmem>>, vector<8x128xf32>,
    %cst_22 = arith.constant 0.000000e+00 : f32
    %32 = vector.broadcast %cst_22 : f32 to vector<8x128xf32>
    %c0_23 = arith.constant 0 : index
    %c0_24 = arith.constant 0 : index
    %c0_25 = arith.constant 0 : index
    %c0_26 = arith.constant 0 : index
    %33 = vector.load %arg9[%c0_23, %c0_24, %c0_25, %c0_26] : memref<1x1x8x128xf32, #tpu.memory_space<vmem>>, vector<1x1x8x128xf32>
    %34 = vector.shape_cast %33 : vector<1x1x8x128xf32> to vector<8x128xf32>
    %35 = vector.shape_cast %32 : vector<8x128xf32> to vector<1x1x8x128xf32>
    tpu.vector_store %arg9[%c0_23, %c0_24, %c0_25, %c0_26], %35 {strides = array<i32>} : memref<1x1x8x128xf32, #tpu.memory_space<vmem>>, vector<1x1x8x128xf32>,
    %cst_27 = arith.constant dense<0.000000e+00> : vector<128xf32>
    %36 = vector.multi_reduction <add>, %30, %cst_27 [0] : vector<8x128xf32> to vector<128xf32>
    %37 = vector.shape_cast %36 : vector<128xf32> to vector<1x128xf32>
    %c0_28 = arith.constant 0 : index
    %c0_29 = arith.constant 0 : index
    %c0_30 = arith.constant 0 : index
    %c0_31 = arith.constant 0 : index
    %38 = vector.load %arg9[%c0_28, %c0_29, %c0_30, %c0_31] : memref<1x1x8x128xf32, #tpu.memory_space<vmem>>, vector<1x1x1x128xf32>
    %39 = vector.shape_cast %38 : vector<1x1x1x128xf32> to vector<1x128xf32>
    %40 = vector.shape_cast %37 : vector<1x128xf32> to vector<1x1x1x128xf32>
    tpu.vector_store %arg9[%c0_28, %c0_29, %c0_30, %c0_31], %40 {strides = array<i32>} : memref<1x1x8x128xf32, #tpu.memory_space<vmem>>, vector<1x1x1x128xf32>,
    %41 = arith.mulf %30, %30 : vector<8x128xf32>
    %cst_32 = arith.constant dense<0.000000e+00> : vector<128xf32>
    %42 = vector.multi_reduction <add>, %41, %cst_32 [0] : vector<8x128xf32> to vector<128xf32>
    %43 = vector.shape_cast %42 : vector<128xf32> to vector<1x128xf32>
    %c0_33 = arith.constant 0 : index
    %c0_34 = arith.constant 0 : index
    %c1_35 = arith.constant 1 : index
    %c0_36 = arith.constant 0 : index
    %44 = vector.load %arg9[%c0_33, %c0_34, %c1_35, %c0_36] : memref<1x1x8x128xf32, #tpu.memory_space<vmem>>, vector<1x1x1x128xf32>
    %45 = vector.shape_cast %44 : vector<1x1x1x128xf32> to vector<1x128xf32>
    %46 = vector.shape_cast %43 : vector<1x128xf32> to vector<1x1x1x128xf32>
    tpu.vector_store %arg9[%c0_33, %c0_34, %c1_35, %c0_36], %46 {strides = array<i32>} : memref<1x1x8x128xf32, #tpu.memory_space<vmem>>, vector<1x1x1x128xf32>,
    return
  }
  func.func @transform_0(%arg0: i32, %arg1: i32) -> (i32, i32) {
    %c2_i32 = arith.constant 2 : i32
    %0 = arith.muli %arg0, %c2_i32 : i32
    %c1_i32 = arith.constant 1 : i32
    %1 = arith.muli %arg1, %c1_i32 : i32
    %2 = arith.addi %0, %1 : i32
    %c1_i32_0 = arith.constant 1 : i32
    %3 = arith.subi %2, %c1_i32_0 : i32
    %c0_i32 = arith.constant 0 : i32
    %4 = arith.maxsi %3, %c0_i32 : i32
    %c0_i32_1 = arith.constant 0 : i32
    %c0_i32_2 = arith.constant 0 : i32
    return %4, %c0_i32_1 : i32, i32
  }
  func.func @transform_1(%arg0: i32, %arg1: i32) -> (i32, i32) {
    %c2_i32 = arith.constant 2 : i32
    %0 = arith.muli %arg0, %c2_i32 : i32
    %1 = arith.addi %0, %arg1 : i32
    %c0_i32 = arith.constant 0 : i32
    %c0_i32_0 = arith.constant 0 : i32
    return %1, %c0_i32 : i32, i32
  }
  func.func @transform_2(%arg0: i32, %arg1: i32) -> (i32, i32) {
    %c2_i32 = arith.constant 2 : i32
    %0 = arith.muli %arg0, %c2_i32 : i32
    %c1_i32 = arith.constant 1 : i32
    %1 = arith.addi %arg1, %c1_i32 : i32
    %c1_i32_0 = arith.constant 1 : i32
    %2 = arith.muli %1, %c1_i32_0 : i32
    %3 = arith.addi %0, %2 : i32
    %c3_i32 = arith.constant 3 : i32
    %4 = arith.minsi %3, %c3_i32 : i32
    %c0_i32 = arith.constant 0 : i32
    %c0_i32_1 = arith.constant 0 : i32
    return %4, %c0_i32 : i32, i32
  }
  func.func @transform_3(%arg0: i32, %arg1: i32) -> (i32, i32, i32) {
    %c0_i32 = arith.constant 0 : i32
    %c0_i32_0 = arith.constant 0 : i32
    %c0_i32_1 = arith.constant 0 : i32
    %c0_i32_2 = arith.constant 0 : i32
    return %c0_i32, %c0_i32_0, %c0_i32_1 : i32, i32, i32
  }
  func.func @transform_4(%arg0: i32, %arg1: i32) -> (i32, i32) {
    %c0_i32 = arith.constant 0 : i32
    %c0_i32_0 = arith.constant 0 : i32
    %c0_i32_1 = arith.constant 0 : i32
    return %c0_i32, %c0_i32_0 : i32, i32
  }
  func.func @transform_5(%arg0: i32, %arg1: i32) -> (i32, i32) {
    %c0_i32 = arith.constant 0 : i32
    %c0_i32_0 = arith.constant 0 : i32
    %c0_i32_1 = arith.constant 0 : i32
    return %c0_i32, %c0_i32_0 : i32, i32
  }
  func.func @transform_6(%arg0: i32, %arg1: i32) -> (i32, i32) {
    %c2_i32 = arith.constant 2 : i32
    %0 = arith.muli %arg0, %c2_i32 : i32
    %1 = arith.addi %0, %arg1 : i32
    %c0_i32 = arith.constant 0 : i32
    %c0_i32_0 = arith.constant 0 : i32
    return %1, %c0_i32 : i32, i32
  }
  func.func @transform_7(%arg0: i32, %arg1: i32) -> (i32, i32, i32, i32) {
    %c0_i32 = arith.constant 0 : i32
    %c0_i32_0 = arith.constant 0 : i32
    %c0_i32_1 = arith.constant 0 : i32
    return %arg0, %arg1, %c0_i32, %c0_i32_0 : i32, i32, i32, i32
  }
}

</mosaic_0001>

<bundles_post_ra>
// kernel: tpu_custom_call.1
= control target key start
LH: loop header
LB: loop body
LE: loop exit
PB: predicated region body
PF: predicated region fallthrough
CT: control target
= control target key end

     0   :  { %s2292_s0 = inlined_call_operand.hbm [shape: f32[32,64], index: 0, kind: input, shape index: {}]   ;;  %s2293_s1 = inlined_call_operand.hbm [shape: f32[32,64], index: 1, kind: input, shape index: {}]   ;;  %s2294_s2 = inlined_call_operand.hbm [shape: f32[32,64], index: 2, kind: input, shape index: {}]   ;;  %s2295_s3 = inlined_call_operand.hbm [shape: f32[3,64,128], index: 3, kind: input, shape index: {}]   ;;  %s2296_s4 = inlined_call_operand.vmem [shape: f32[1,64], index: 4, kind: input, shape index: {}]   ;;  %s2297_s5 = inlined_call_operand.vmem [shape: f32[1,64], index: 5, kind: input, shape index: {}]   ;;  %s2298_s6 = inlined_call_operand.hbm [shape: f32[32,128], index: 6, kind: output, shape index: {0}]   ;;  %s2299_s7 = inlined_call_operand.hbm [shape: f32[2,2,8,128], index: 7, kind: output, shape index: {1}]  }
   0x1   :  { %2326 = sst [smem:[#allocation36_spill]] %s2292_s0 }
   0x2   :  { %2327 = sst [smem:[#allocation37_spill]] %s2293_s1 }
   0x3   :  { %2328 = sst [smem:[#allocation38_spill]] %s2294_s2 }
   0x4   :  { %2329 = sst [smem:[#allocation39_spill]] %s2298_s6 }
   0x5   :  { %2330 = sst [smem:[#allocation40_spill]] %s2299_s7 }
   0x6   :  { %13 = vsyncpa [#allocation4], 0 }
   0x7   :  { %15 = vsyncpa [#allocation4 + $0x1], 0 }
   0x8   :  { %16 = vsyncpa [#allocation7], 0 }
   0x9   :  { %18 = vsyncpa [#allocation7 + $0x1], 0 }
   0xa   :  { %19 = vsyncpa [#allocation10], 0 }
   0xb   :  { %20 = vsyncpa [#allocation5], 0 }
   0xc   :  { %22 = vsyncpa [#allocation5 + $0x1], 0 }
   0xd   :  { %23 = vsyncpa [#allocation13], 0 }
   0xe   :  { %25 = vsyncpa [#allocation13 + $0x1], 0  ;;  %s1689_s24 = smov 0   ;;  %s1691_s4 = smov 0  }
   0xf   :  { %s1693_s5 = smov 0   ;;  %s1695_s25 = smov 0  }
  0x10   :  { %s1697_s26 = smov 0   ;;  %s1699_s27 = smov 0  }
  0x11   :  { %s1701_s28 = smov 0   ;;  %s1703_s29 = smov 0  }
  0x12   :  { %s1705_s30 = smov 0   ;;  %s1707_s8 = smov 0  }
  0x13   :  { %s1709_s9 = smov 0   ;;  %s1711_s10 = smov 0  }
  0x14   :  { %s1713_s11 = smov 0   ;;  %s1715_s12 = smov 0  }
  0x15   :  { %s1717_s13 = smov 0   ;;  %s1719_s14 = smov 0  }
  0x16   :  { %s1721_s15 = smov 0  }
  0x17 LB: > { %2331 = sst [smem:[#allocation20_spill]] %s1572_s24  ;;  %s1775_s16 = sadd.s32 4294967295, %s1636_s15   ;;  %s1636_s15 = sphi %s1721_s15, %s31_s15   ;;  %s1632_s14 = sphi %s1719_s14, %s2410_s14   ;;  %s1628_s13 = sphi %s1717_s13, %s2409_s13   ;;  %s1624_s12 = sphi %s1715_s12, %s2419_s12   ;;  %s1620_s11 = sphi %s1713_s11, %s2407_s11   ;;  %s1616_s10 = sphi %s1711_s10, %s2418_s10   ;;  %s1612_s9 = sphi %s1709_s9, %s2417_s9   ;;  %s1608_s8 = sphi %s1707_s8, %s2416_s8   ;;  %s1604_s30 = sphi %s1705_s30, %s2406_s30   ;;  %s1600_s29 = sphi %s1703_s29, %s2415_s29   ;;  %s1596_s28 = sphi %s1701_s28, %s2414_s28   ;;  %s1592_s27 = sphi %s1699_s27, %s2413_s27   ;;  %s1588_s26 = sphi %s1697_s26, %s2404_s26   ;;  %s1584_s25 = sphi %s1695_s25, %s2403_s25   ;;  %s1580_s5 = sphi %s1693_s5, %s2402_s5   ;;  %s1576_s4 = sphi %s1691_s4, %s2412_s4   ;;  %s1572_s24 = sphi %s1689_s24, %s2411_s24  }
  0x18   : > { %2332 = sst [smem:[#allocation21_spill]] %s1580_s5  ;;  %s40_s18 = sadd.s32 1, %s1628_s13 }
  0x19   : > { %2333 = sst [smem:[#allocation22_spill]] %s1584_s25  ;;  %s43_s19 = sadd.s32 1, %s1632_s14 }
  0x1a   : > { %2334 = sst [smem:[#allocation23_spill]] %s1588_s26  ;;  %p41_p0 = scmp.ge.s32.totalorder %s40_s18, 2 }
  0x1b   : > { %2335 = sst [smem:[#allocation24_spill]] %s1592_s27  ;;  %s959_s20 = sshll.u32 %s1632_s14, 1 }
  0x1c   : > { %2336 = sst [smem:[#allocation25_spill]] %s1604_s30  ;;  %s1782_s21 = sadd.s32 %s1628_s13, %s959_s20 }
  0x1d   : > { %2337 = sst [smem:[#allocation26_spill]] %s1620_s11  ;;  %p2311_p1 = scmp.eq.s32.totalorder %s1636_s15, 0 }
  0x1e   : > { %2338 = sst [smem:[#allocation27_spill]] %s1624_s12  ;;  %s2421_s19 = smov (!%p41_p0, %s43_s19), %s1632_s14 }
  0x1f   : > { %2339 = sst [smem:[#allocation28_spill]] %s1628_s13  ;;  %p2319_p2 = scmp.eq.s32.totalorder %s1775_s16, 0 }
  0x20   : > { %2340 = sst [smem:[#allocation29_spill]] %s1632_s14  ;;  %s90_s23 = sadd.s32 1, %s1604_s30 }
  0x21   : > { %s1785_s22 = scalar_select %p41_p0, 0, %s40_s18  }
  0x22   : > { %p45_p3 = scmp.ge.s32.totalorder %s2421_s19, 2  ;;  %p97_p4 = scmp.ne.s32.totalorder %s1604_s30, %s1600_s29 }
  0x23   : > { %2341 = sst [smem:[#allocation30_spill]] %s1785_s22  ;;  %p103_p5 = scmp.ne.s32.totalorder %s1600_s29, %s1596_s28 }
  0x24   : > { %s1794_s17 = sadd.s32 %s959_s20, %s40_s18  ;;  %s2423_s19 = smov (%p45_p3, %s2421_s19), 0 }
  0x25   : > { %2342 = sst [smem:[#allocation31_spill]] %s1794_s17  ;;  %p1803_p6 = por %p97_p4, %p2311_p1 }
  0x26   : > { %2343 = sst [smem:[#allocation32_spill]] %s2423_s19  ;;  %p1812_p7 = por %p103_p5, %p2319_p2 }
  0x27   : > { %s961_s20 = sshll.u32 %s2423_s19, 1  ;;  %s119_s12 = sadd.s32 1, %s1785_s22 }
  0x28   : > { %s2345_s18 = scalar_select %p1812_p7, 1, 0 }
  0x29   : > { %s1819_s6 = sadd.s32 %s961_s20, %s1785_s22  ;;  %s1831_s25 = sadd.s32 %s961_s20, %s119_s12 }
  0x2a   : > { %2346 = sst [smem:[#allocation33_spill]] %s2345_s18  ;;  %s2307_s11 = sadd.s32 4294967295, %s1819_s6 }
  0x2b   : > { %s87_s2 = ssub.s32 %s1782_s21, %s1819_s6  ;;  %p1827_p9 = scmp.gt.s32.totalorder %s2307_s11, 0 }
  0x2c   : > { %p88_p10 = scmp.eq.s32.totalorder %s87_s2, 0  ;;  %p230_p11 = scmp.eq.s32.totalorder %s1775_s16, 3 }
  0x2d   : > { %s2347_s18 = scalar_select %p1827_p9, 1, 0 }
  0x2e   : > { %s1835_s26 = scalar_select %p88_p10, %s1604_s30, %s90_s23  }
  0x2f   : > { %p1843_p13 = por %p230_p11, %p97_p4  ;;  %s2350_s17 = sadd.s32 4294967294, %s1636_s15  }
  0x30   : > { %2348 = sst [smem:[#allocation34_spill]] %s1835_s26  ;;  %p236_p0 = scmp.eq.s32.totalorder %s2350_s17, 3 }
  0x31   : > { %s2349_s11 = scalar_select %p1843_p13, 1, 0 }
  0x32   : > { %s242_s2 = ssub.s32 %s1632_s14, %s2423_s19  ;;  %s243_s12 = ssub.s32 %s1628_s13, %s1785_s22 }
  0x33   : > { %s247_s20 = sadd.s32 1, %s1580_s5  ;;  %p1857_p3 = por %p236_p0, %p103_p5 }
  0x34   : > { %s244_s23 = sor.u32 %s243_s12, %s242_s2  ;;  %p257_p12 = scmp.ne.s32.totalorder %s1580_s5, %s1576_s4 }
  0x35   : > { %s2351_s27 = scalar_select %p1857_p3, 1, 0 }
  0x36   : > { %p245_p10 = scmp.eq.s32.totalorder %s244_s23, 0  ;;  %p263_p4 = scmp.ne.s32.totalorder %s1576_s4, %s1572_s24 }
  0x37   : > { %p1870_p8 = por %p257_p12, %p230_p11  ;;  %p2318_p5 = scmp.lt.s32.totalorder %s1636_s15, 4 }
  0x38   : > { %s1866_s26 = scalar_select %p245_p10, %s1580_s5, %s247_s20  }
  0x39   : > { %s2353_s17 = scalar_select %p1870_p8, 1, 0 }
  0x3a   : > { %2352 = sst [smem:[#allocation35_spill]] %s1866_s26  ;;  %p1874_p1 = por %p263_p4, %p236_p0 }
  0x3b   : > { %s326_s22 = sand.u32 1, %s1636_s15   ;;  %s328_s14 = sand.u32 1, %s1604_s30  }
  0x3c   : > { %s2354_s19 = scalar_select %p1874_p1, 1, 0 }
  0x3d   : > { %s976_s2 = sshll.u32 %s328_s14, 3  ;;  %s978_s12 = sshll.u32 %s1782_s21, 7 }
  0x3e   : > { %s2355_s1 = sld [smem:[#allocation37_spill]]  ;;  %s330_s20 = scalar_lea.vmem [#allocation6], %s976_s2 }
  0x3f   : > { %s339_s26 = sshll.u32 %s330_s20, 4  ;;  %p1893_p11 = pnand %p2318_p5, %p1803_p6  ;;  %s1887_s26 = int_to_ptr.vmem [resolvable:$true] %s339_s26 }
  0x40   : > { %s1897_s14 = scalar_lea.sflag [#allocation7], %s326_s22 }
  0x41   : > { %p1306_p0 = pneg %p1893_p11 }
  0x44   : > { %s1885_s24 = scalar_lea.hbm %s2355_s1, %s978_s12  ;;  %s1309_s7 = scalar_lea.hbm %s2355_s1, 512 }
  0x45   : > { %s1304_s13 = scalar_lea.hbm %s1885_s24, 128  ;;  %p1310_p6 = scmp.lt.u32.totalorder %s1885_s24, %s2355_s1 }
  0x46   : > { %p1305_p12 = scmp.ne.s32.totalorder %s1885_s24, %s1304_s13  ;;  %p1311_p5 = scmp.lt.u32.totalorder %s1309_s7, %s1304_s13 }
  0x47   : > { %p1313_p1 = scmp.lt.u32.totalorder %s1304_s13, %s1885_s24 }
  0x48   : > { %p1307_p10 = pnand %p1306_p0, %p1305_p12  ;;  %p1312_p2 = por %p1311_p5, %p1310_p6 }
  0x4a   : > { %p1308_p4 = pneg %p1307_p10  ;;  %p1314_p3 = por %p1313_p1, %p1312_p2 }
  0x4c   : > { %p1315_p8 = pnand %p1314_p3, %p1308_p4 }
  0x4e   : > { %1318 = shalt.err (!%p1315_p8)
}
  0x4f   : > { %s1319_s22 = scalar_lea.vmem %s1887_s26, 128  ;;  %s1638_s2 = smov [#allocation6]  }
  0x50   : > { %p1320_p12 = scmp.ne.s32.totalorder %s1887_s26, %s1319_s22  ;;  %s1324_s12 = sshll.u32 %s1638_s2, 4  ;;  %s1325_s12 = int_to_ptr.vmem [resolvable:$false] %s1324_s12 }
  0x51   : > { %s1326_s23 = scalar_lea.vmem %s1325_s12, 256  ;;  %p1327_p7 = scmp.lt.s32.totalorder %s1887_s26, %s1325_s12 }
  0x52   : > { %p1322_p10 = pnand %p1320_p12, %p1306_p0  ;;  %p1328_p5 = scmp.lt.s32.totalorder %s1326_s23, %s1319_s22 }
  0x54   : > { %p1323_p13 = pneg %p1322_p10  ;;  %p1329_p6 = por %p1328_p5, %p1327_p7 }
  0x56   : > { %p1330_p1 = pnand %p1329_p6, %p1323_p13 }
  0x58   : > { %1333 = shalt.err (!%p1330_p1)
}
  0x59   : > { %1147 = dma.hbm_to_vmem [thread:$0]  (!%p1893_p11), %s1885_s24, 128, %s1887_s26, %s1897_s14  }
  0x5a   : > { %p969_p2 = scmp.ge.s32.totalorder %s1636_s15, 1  ;;  %p271_p8 = scmp.lt.s32.totalorder %s1636_s15, 5 }
  0x5b   : > { %s1639_s13 = smov [#allocation9]   ;;  %p2358_p13 = scmp.eq.s32.totalorder %s1775_s16, 0 }
  0x5c   : > { %s283_s7 = sshll.u32 %s1639_s13, 4  ;;  %p1927_p3 = pnand %p969_p2, %p271_p8  ;;  %s284_s7 = int_to_ptr.vmem [resolvable:$true] %s283_s7 }
  0x5d   : > { %s960_s22 = sadd.s32 4294967295, %s1782_s21  ;;  %s1334_s12 = scalar_lea.hbm %s2295_s3, 3072 }
  0x5e   : > { %s2357_s20 = scalar_select %p1927_p3, 1, 0 }
  0x5f   : > { %p1137_p7 = pneg %p1927_p3  ;;  %p1940_p11 = scmp.gt.s32.totalorder %s960_s22, 0 }
  0x60   : > { %p1335_p4 = scmp.ne.s32.totalorder %s2295_s3, %s1334_s12  ;;  %p1341_p6 = scmp.lt.u32.totalorder %s1334_s12, %s2295_s3 }
  0x61   : > { %p1935_p0 = pnand %p1137_p7, %p2358_p13 }
  0x62   : > { %s2360_s24 = scalar_select %p1940_p11, 1, 0 }
  0x63   : > { %p1336_p12 = pneg %p1935_p0 }
  0x65   : > { %p1337_p10 = pnand %p1336_p12, %p1335_p4 }
  0x67   : > { %p1338_p5 = pneg %p1337_p10 }
  0x69   : > { %p1343_p1 = pnand %p1341_p6, %p1338_p5 }
  0x6b   : > { %1346 = shalt.err (!%p1343_p1)
}
  0x6c   : > { %s1347_s21 = scalar_lea.vmem %s284_s7, 3072  ;;  %p1355_p13 = scmp.lt.s32.totalorder %s284_s7, %s284_s7 }
  0x6d   : > { %p1348_p2 = scmp.ne.s32.totalorder %s284_s7, %s1347_s21  ;;  %p1356_p3 = scmp.lt.s32.totalorder %s1347_s21, %s1347_s21 }
  0x6f   : > { %p1350_p8 = pnand %p1348_p2, %p1336_p12  ;;  %p1357_p9 = por %p1356_p3, %p1355_p13 }
  0x71   : > { %p1351_p7 = pneg %p1350_p8 }
  0x73   : > { %p1358_p11 = pnand %p1357_p9, %p1351_p7 }
  0x75   : > { %1361 = shalt.err (!%p1358_p11)
}
  0x76   : > { %s1640_s26 = smov 128   ;;  %s1641_s1 = smov 8  }
  0x77   : > { %1140 = dma.hbm_to_vmem [thread:$0]  (!%p1935_p0), %s2295_s3, 3072, %s284_s7, [#allocation10], %s1640_s26, %s1640_s26, %s1641_s1  }
  0x78   : > { %p2361_p9 = scmp.ne.s32.totalorder %s2360_s24, 0  ;;  %s2362_s12 = sadd.s32 4294967295, %s1819_s6 }
  0x79   : > { %p2363_p3 = scmp.ne.s32.totalorder %s2347_s18, 0  ;;  %s60_s23 = sadd.s32 1, %s1616_s10 }
  0x7a   : > { %s2425_s22 = smov (!%p2361_p9, %s960_s22), 0  ;;  %p67_p11 = scmp.ne.s32.totalorder %s1616_s10, %s1612_s9 }
  0x7b   : > { %s2427_s12 = smov (!%p2363_p3, %s2362_s12), 0  ;;  %p73_p4 = scmp.ne.s32.totalorder %s1612_s9, %s1608_s8 }
  0x7c   : > { %s57_s13 = ssub.s32 %s2425_s22, %s2427_s12  ;;  %p2364_p10 = scmp.eq.s32.totalorder %s1636_s15, 0 }
  0x7d   : > { %p58_p12 = scmp.eq.s32.totalorder %s57_s13, 0  ;;  %p2365_p6 = scmp.eq.s32.totalorder %s1775_s16, 0 }
  0x7e   : > { %p69_p5 = por %p2364_p10, %p67_p11  ;;  %s303_s21 = sand.u32 1, %s1616_s10  }
  0x7f   : > { %p1975_p1 = por %p2365_p6, %p73_p4  ;;  %s972_s24 = sshll.u32 %s303_s21, 3 }
  0x80   : > { %s1981_s7 = scalar_select %p58_p12, %s1616_s10, %s60_s23  }
  0x81   : > { %s975_s6 = sshll.u32 %s2425_s22, 7  ;;  %s2367_s0 = sld [smem:[#allocation36_spill]] }
  0x82   : > { %s307_s8 = scalar_lea.vmem [#allocation3], %s972_s24  ;;  %p2368_p0 = scmp.lt.s32.totalorder %s1636_s15, 4 }
  0x83   : > { %s319_s30 = sshll.u32 %s307_s8, 4  ;;  %s304_s22 = scalar_lea.sflag [#allocation4], %s303_s21  ;;  %s1988_s30 = int_to_ptr.vmem [resolvable:$true] %s319_s30 }
  0x84   : > { %p1992_p2 = pnand %p2368_p0, %p69_p5 }
  0x86   : > { %p1364_p7 = pneg %p1992_p2 }
  0x87   : > { %s1986_s1 = scalar_lea.hbm %s2367_s0, %s975_s6  ;;  %s1367_s24 = scalar_lea.hbm %s2367_s0, 512 }
  0x88   : > { %s1362_s12 = scalar_lea.hbm %s1986_s1, 128  ;;  %p1368_p3 = scmp.lt.u32.totalorder %s1986_s1, %s2367_s0 }
  0x89   : > { %p1363_p8 = scmp.ne.s32.totalorder %s1986_s1, %s1362_s12  ;;  %p1369_p11 = scmp.lt.u32.totalorder %s1367_s24, %s1362_s12 }
  0x8a   : > { %p1371_p12 = scmp.lt.u32.totalorder %s1362_s12, %s1986_s1 }
  0x8b   : > { %p1365_p13 = pnand %p1364_p7, %p1363_p8  ;;  %p1370_p4 = por %p1369_p11, %p1368_p3 }
  0x8d   : > { %p1366_p9 = pneg %p1365_p13  ;;  %p1372_p10 = por %p1371_p12, %p1370_p4 }
  0x8f   : > { %p1373_p5 = pnand %p1372_p10, %p1366_p9 }
  0x91   : > { %1376 = shalt.err (!%p1373_p5)
}
  0x92   : > { %s1377_s21 = scalar_lea.vmem %s1988_s30, 128  ;;  %s1642_s26 = smov [#allocation3]  }
  0x93   : > { %p1378_p6 = scmp.ne.s32.totalorder %s1988_s30, %s1377_s21  ;;  %s1382_s8 = sshll.u32 %s1642_s26, 4  ;;  %s1383_s8 = int_to_ptr.vmem [resolvable:$false] %s1382_s8 }
  0x94   : > { %s1384_s23 = scalar_lea.vmem %s1383_s8, 256  ;;  %p1385_p13 = scmp.lt.s32.totalorder %s1988_s30, %s1383_s8 }
  0x95   : > { %p1380_p0 = pnand %p1378_p6, %p1364_p7  ;;  %p1386_p3 = scmp.lt.s32.totalorder %s1384_s23, %s1377_s21 }
  0x97   : > { %p1381_p8 = pneg %p1380_p0  ;;  %p1387_p11 = por %p1386_p3, %p1385_p13 }
  0x99   : > { %p1388_p4 = pnand %p1387_p11, %p1381_p8 }
  0x9b   : > { %1391 = shalt.err (!%p1388_p4)
}
  0x9c   : > { %s2370_s12 = sld [smem:[#allocation24_spill]]  ;;  %s2371_s13 = sld [smem:[#allocation31_spill]] }
  0x9d   : > { %s2372_s24 = sld [smem:[#allocation23_spill]]  ;;  %s2373_s6 = sld [smem:[#allocation22_spill]] }
  0x9e   : > { %1144 = dma.hbm_to_vmem [thread:$0]  (!%p1992_p2), %s1986_s1, 128, %s1988_s30, %s304_s22  }
  0x9f   : > { %p2375_p9 = scmp.lt.s32.totalorder %s1831_s25, 3  ;;  %p2376_p6 = scmp.eq.s32.totalorder %s1636_s15, 0 }
  0xa0   : > { %p2377_p8 = scmp.eq.s32.totalorder %s1775_s16, 0  ;;  %s2379_s23 = sld [smem:[#allocation38_spill]] }
  0xa1   : > { %s2431_s25 = smov (!%p2375_p9, %s1831_s25), 3  ;;  %p2380_p2 = scmp.lt.s32.totalorder %s1636_s15, 4 }
  0xa2   : > { %s126_s18 = sadd.s32 1, %s2370_s12  ;;  %p2374_p7 = scmp.lt.s32.totalorder %s2371_s13, 3 }
  0xa3   : > { %p133_p12 = scmp.ne.s32.totalorder %s2370_s12, %s2372_s24  ;;  %p139_p10 = scmp.ne.s32.totalorder %s2372_s24, %s2373_s6 }
  0xa4   : > { %s2429_s13 = smov (!%p2374_p7, %s2371_s13), 3  ;;  %s348_s21 = sand.u32 1, %s2370_s12  }
  0xa5   : > { %s123_s2 = ssub.s32 %s2429_s13, %s2431_s25  ;;  %p135_p0 = por %p133_p12, %p2376_p6 }
  0xa6   : > { %p124_p5 = scmp.eq.s32.totalorder %s123_s2, 0  ;;  %p2037_p13 = por %p139_p10, %p2377_p8 }
  0xa7   : > { %s979_s8 = sshll.u32 %s348_s21, 3  ;;  %s981_s1 = sshll.u32 %s2429_s13, 7 }
  0xa8   : > { %s2378_s26 = scalar_select %p2037_p13, 1, 0 }
  0xa9   : > { %s2433_s12 = smov (!%p124_p5, %s2370_s12), %s126_s18  ;;  %s2047_s0 = scalar_lea.hbm %s2379_s23, %s981_s1 }
  0xaa   : > { %s350_s25 = scalar_lea.vmem [#allocation8], %s979_s8  ;;  %p2053_p3 = pnand %p2380_p2, %p135_p0 }
  0xab   : > { %s362_s24 = sshll.u32 %s350_s25, 4  ;;  %s1392_s13 = scalar_lea.hbm %s2047_s0, 128  ;;  %s2049_s24 = int_to_ptr.vmem [resolvable:$true] %s362_s24 }
  0xac   : > { %p1393_p11 = scmp.ne.s32.totalorder %s2047_s0, %s1392_s13  ;;  %p1394_p4 = pneg %p2053_p3 }
  0xad   : > { %s1397_s21 = scalar_lea.hbm %s2379_s23, 512  ;;  %p1398_p12 = scmp.lt.u32.totalorder %s2047_s0, %s2379_s23 }
  0xae   : > { %p1395_p7 = pnand %p1394_p4, %p1393_p11  ;;  %p1399_p10 = scmp.lt.u32.totalorder %s1397_s21, %s1392_s13 }
  0xaf   : > { %p1401_p6 = scmp.lt.u32.totalorder %s1392_s13, %s2047_s0 }
  0xb0   : > { %p1396_p9 = pneg %p1395_p7  ;;  %p1400_p5 = por %p1399_p10, %p1398_p12 }
  0xb2   : > { %p1402_p0 = por %p1401_p6, %p1400_p5 }
  0xb4   : > { %p1403_p8 = pnand %p1402_p0, %p1396_p9 }
  0xb6   : > { %1406 = shalt.err (!%p1403_p8)
}
  0xb7   : > { %s1407_s30 = scalar_lea.vmem %s2049_s24, 128  ;;  %s1643_s22 = smov [#allocation8]  }
  0xb8   : > { %p1408_p2 = scmp.ne.s32.totalorder %s2049_s24, %s1407_s30  ;;  %s1412_s25 = sshll.u32 %s1643_s22, 4  ;;  %s1413_s25 = int_to_ptr.vmem [resolvable:$false] %s1412_s25 }
  0xb9   : > { %s1414_s18 = scalar_lea.vmem %s1413_s25, 256  ;;  %p1415_p13 = scmp.lt.s32.totalorder %s2049_s24, %s1413_s25 }
  0xba   : > { %p1410_p11 = pnand %p1408_p2, %p1394_p4  ;;  %p1416_p12 = scmp.lt.s32.totalorder %s1414_s18, %s1407_s30 }
  0xbc   : > { %p1411_p7 = pneg %p1410_p11  ;;  %p1417_p10 = por %p1416_p12, %p1415_p13 }
  0xbe   : > { %p1418_p5 = pnand %p1417_p10, %p1411_p7 }
  0xc0   : > { %1421 = shalt.err (!%p1418_p5)
}
  0xc1   : > { %1150 = dma.hbm_to_vmem [thread:$0]  (!%p2053_p3), %s2047_s0, 128, %s2049_s24, %s1897_s14  }
  0xc2   : > { %p2382_p9 = scmp.ne.s32.totalorder %s2357_s20, 0 }
  0xc3   : > { %s373_s13 = sand.u32 (!%p2382_p9), 1, %s1612_s9  }
  0xc4   : > { %371 = sbr.rel (%p2382_p9) target bundleno = 520 (0x208), region = 44  ;;  %s2086_s2 = sshll.u32 (!%p2382_p9), %s373_s13, 3 }
  0xc5   : > { %s374_s21 = scalar_lea.sflag (!%p2382_p9), [#allocation4], %s373_s13  ;;  %s377_s8 = scalar_lea.vmem (!%p2382_p9), [#allocation3], %s2086_s2 }
  0xcb   : > { %1547 = dma.done.wait (%p1975_p1), %s374_s21, 128  }
  0xcc   : > { %1549 = vsyncadd (%p1975_p1), %s374_s21, 4294967168  ;;  %s2383_s0 = sld [smem:[#allocation33_spill]]  ;;  %s382_s14 = sand.u32 1, %s1775_s16  }
  0xcd   : > { %s384_s20 = sand.u32 1, %s1600_s29   ;;  %s383_s6 = scalar_lea.sflag [#allocation7], %s382_s14 }
  0xce   : > { %s2097_s24 = sshll.u32 %s384_s20, 3 }
  0xcf   : > { %s386_s1 = scalar_lea.vmem [#allocation6], %s2097_s24 }
  0xd2   : > { %p2384_p13 = scmp.ne.s32.totalorder %s2383_s0, 0 }
  0xd4   : > { %1551 = dma.done.wait (%p2384_p13), %s383_s6, 128  }
  0xd5   : > { %1553 = vsyncadd (%p2384_p13), %s383_s6, 4294967168  ;;  %s2385_s30 = sld [smem:[#allocation23_spill]]  ;;  %p2386_p1 = scmp.ne.s32.totalorder %s2378_s26, 0 }
  0xdb   : > { %s393_s5 = sand.u32 1, %s2385_s30  }
  0xdc   : > { %s2105_s22 = sshll.u32 %s393_s5, 3 }
  0xdd   : > { %s395_s25 = scalar_lea.vmem [#allocation8], %s2105_s22 }
  0xde   : > { %1555 = dma.done.wait (%p2386_p1), %s383_s6, 128  }
  0xdf   : > { %1557 = vsyncadd (%p2386_p1), %s383_s6, 4294967168  ;;  %p2387_p3 = scmp.eq.s32.totalorder %s1775_s16, 0 }
  0xe1   : > { %1559 = dma.done.wait (%p2387_p3), [#allocation10], 3072   ;;  %p2388_p4 = pmov %p2387_p3 }
  0xe2   : > { %s2389_s18 = sld [smem:[#allocation26_spill]]  ;;  %s442_s13 = sand.u32 1, %s1576_s4   ;;  %v1644_v0 = vmov 0.0|0.0   ;;  %vm1645_vm0 = vmmov 0   ;;  %v1646_v1 = vmov 0.0   ;;  %v479_v2 = vld [vmem:[#allocation9] sm:$0xff] }
  0xe3   : > { %1561 = vsyncadd (%p2388_p4), [#allocation10], 4294964224  ;;  %1096 = vmatprep.subr.bf16.mxu0 %v1644_v0  ;;  %1084 = vmatprep.subr.bf16.mxu1 %v1644_v0  ;;  %s988_s21 = sshll.u32 %s442_s13, 3  ;;  %v480_v3 = vld [vmem:[#allocation9 + $0x8] sm:$0xff]  ;;  %v481_v4 = vld [vmem:[#allocation9 + $0x10] sm:$0xff]  ;;  %vm468_vm1 = vcmask 523264  }
  0xe4   : > { %1062 = vmatprep.mubr.msk.f32.mxu0 %vm1645_vm0, %v1646_v1  ;;  %1043 = vmatprep.mubr.msk.f32.mxu1 %vm1645_vm0, %v1646_v1  ;;  %s2127_s16 = scalar_lea.vmem [#allocation12], %s988_s21  ;;  %v1097_v5 = vpack.c.bf16 %v480_v3, %v479_v2  ;;  %v482_v6 = vld [vmem:[#allocation9 + $0x18] sm:$0xff]  ;;  %v488_v8 = vld [vmem:[#allocation9 + $0x40] sm:$0xff]  ;;  %v489_v11 = vld [vmem:[#allocation9 + $0x48] sm:$0xff]  ;;  %vm465_vm2 = vcmask 516096   ;;  %vm498_vm3 = vcmask 1046528  }
  0xe5   : > { %733 = vst [vmem:[%s2127_s16] sm:$0xff] %v1646_v1  ;;  %v1100_v10 = vpack.c.bf16 %v482_v6, %v481_v4  ;;  %v459_v12 = vld [vmem:[%s377_s8 + $0x7] sm:$0x1]  ;;  %v467_v13 = vld [vmem:[%s386_s1] sm:$0xff]  ;;  %v1085_v16 = vpack.c.bf16 %v489_v11, %v488_v8  ;;  %v470_v18 = vld [vmem:[%s395_s25] sm:$0x1]  ;;  %s2390_s2 = sld [smem:[#allocation27_spill]] }
  0xe6   : > { %1098 = vmatpush3.bf16.msra.mxu0 %v1097_v5  ;;  %v483_v14 = vld [vmem:[#allocation9 + $0x20] sm:$0xff]  ;;  %v484_v15 = vld [vmem:[#allocation9 + $0x28] sm:$0xff]  ;;  %469 = vst.msk [vmem:[#allocation2 + $0x1] sm:$0xff] %vm468_vm1, %v467_v13  ;;  %v490_v20 = vld [vmem:[#allocation9 + $0x50] sm:$0xff]  ;;  %vm655_vm4 = vcmask 1045504   ;;  %s437_s5 = scalar_lea.vmem [#allocation11], %s2097_s24 }
  0xe7   : > { %1099 = vmatprep.subr.bf16.mxu0 %v1644_v0  ;;  %v491_v21 = vld [vmem:[#allocation9 + $0x58] sm:$0xff]  ;;  %1086 = vmatpush3.bf16.msra.mxu1 %v1085_v16  ;;  %v1103_v23 = vpack.c.bf16 %v484_v15, %v483_v14  ;;  %v492_v24 = vld [vmem:[#allocation9 + $0x60] sm:$0xff]  ;;  %v493_v25 = vld [vmem:[#allocation9 + $0x68] sm:$0xff]  ;;  %s770_s22 = sshll.u32 %s437_s5, 4  ;;  %s750_s24 = scalar_lea.sflag [#allocation5], %s384_s20  ;;  %s2168_s22 = int_to_ptr.vmem [resolvable:$true] %s770_s22 }
  0xe8   : > { %p460_p6 = scmp.gt.s32.totalorder %s2389_s18, 0  ;;  %p471_p0 = scmp.lt.s32.totalorder %s2389_s18, 1  ;;  %v1088_v22 = vpack.c.bf16 %v491_v21, %v490_v20  ;;  %1087 = vmatprep.subr.bf16.mxu1 %v1644_v0  ;;  %v485_v26 = vld [vmem:[#allocation9 + $0x30] sm:$0xff]  ;;  %v486_v27 = vld [vmem:[#allocation9 + $0x38] sm:$0xff]  ;;  %v1091_v28 = vpack.c.bf16 %v493_v25, %v492_v24  ;;  %v647_v32 = vld [vmem:[#allocation9 + $0x80] sm:$0xff] }
  0xe9   : > { %v1106_v29 = vpack.c.bf16 %v486_v27, %v485_v26  ;;  %v494_v30 = vld [vmem:[#allocation9 + $0x70] sm:$0xff]  ;;  %v495_v31 = vld [vmem:[#allocation9 + $0x78] sm:$0xff]  ;;  %v648_v33 = vld [vmem:[#allocation9 + $0x88] sm:$0xff]  ;;  %p2393_p2 = scmp.ne.s32.totalorder %s2349_s11, 0 }
  0xea   : > { %s461_s26 = scalar_select %p460_p6, 1, 0  ;;  %1101 = vmatpush3.bf16.msra.mxu0 %v1100_v10  ;;  %v1094_v36 = vpack.c.bf16 %v495_v31, %v494_v30  ;;  %v1109_v38 = vpack.c.bf16 %v648_v33, %v647_v32  ;;  %v649_v40 = vld [vmem:[#allocation9 + $0x90] sm:$0xff]  ;;  %v650_v41 = vld [vmem:[#allocation9 + $0x98] sm:$0xff]  ;;  %v651_v44 = vld [vmem:[#allocation9 + $0xa0] sm:$0xff] }
  0xeb   : > { %s472_s0 = scalar_select %p471_p0, 1, 0  ;;  %1102 = vmatprep.subr.bf16.mxu0 %v1644_v0  ;;  %1089 = vmatpush3.bf16.msra.mxu1 %v1088_v22  ;;  %v1112_v43 = vpack.c.bf16 %v650_v41, %v649_v40  ;;  %v652_v45 = vld [vmem:[#allocation9 + $0xa8] sm:$0xff]  ;;  %v653_v47 = vld [vmem:[#allocation9 + $0xb0] sm:$0xff]  ;;  %v654_v48 = vld [vmem:[#allocation9 + $0xb8] sm:$0xff] }
  0xec   : > { %s462_s14 = scvt.s32.f32 %s461_s26  ;;  %1090 = vmatprep.subr.bf16.mxu1 %v1644_v0  ;;  %v1115_v46 = vpack.c.bf16 %v652_v45, %v651_v44  ;;  %v1118_v50 = vpack.c.bf16 %v654_v48, %v653_v47  ;;  %s994_s8 = sshll.u32 %s2390_s2, 1 }
  0xed   : > { %s473_s6 = scvt.s32.f32 %s472_s0  ;;  %s2157_s1 = sadd.s32 %s2389_s18, %s994_s8 }
  0xee   : > { %v463_v7 = vstv %s462_s14  ;;  %1104 = vmatpush3.bf16.msra.mxu0 %v1103_v23  ;;  %s995_s30 = sshll.u32 %s2157_s1, 7  ;;  %s2391_s26 = sld [smem:[#allocation39_spill]] }
  0xef   : > { %v474_v9 = vstv %s473_s6  ;;  %v464_v17 = vmul.f32 %v463_v7, %v459_v12  ;;  %1105 = vmatprep.subr.bf16.mxu0 %v1644_v0  ;;  %1092 = vmatpush3.bf16.msra.mxu1 %v1091_v28  ;;  %s1422_s18 = scalar_lea.vmem %s2168_s22, 128  ;;  %s1647_s6 = smov [#allocation11]  }
  0xf0   : > { %v475_v19 = vmul.f32 %v474_v9, %v470_v18  ;;  %1093 = vmatprep.subr.bf16.mxu1 %v1644_v0  ;;  %p1423_p8 = scmp.ne.s32.totalorder %s2168_s22, %s1422_s18  ;;  %s1426_s2 = sshll.u32 %s1647_s6, 4  ;;  %s1427_s2 = int_to_ptr.vmem [resolvable:$false] %s1426_s2 }
  0xf1   : > { %466 = vst.msk [vmem:[#allocation2] sm:$0x1] %vm465_vm2, %v464_v17  ;;  %s1428_s8 = scalar_lea.vmem %s1427_s2, 256  ;;  %p1429_p12 = scmp.lt.s32.totalorder %s2168_s22, %s1427_s2 }
  0xf2   : > { %476 = vst.msk [vmem:[#allocation2 + $0x9] sm:$0x1] %vm465_vm2, %v475_v19  ;;  %1107 = vmatpush3.bf16.msra.mxu0 %v1106_v29  ;;  %p1424_p11 = pnand %p1423_p8, %p2393_p2  ;;  %p1430_p10 = scmp.lt.s32.totalorder %s1428_s8, %s1422_s18 }
  0xf3   : > { %1108 = vmatprep.subr.bf16.mxu0 %v1644_v0  ;;  %1095 = vmatpush3.bf16.msra.mxu1 %v1094_v36 }
  0xf4   : > { %s2392_s0 = smov %s2391_s26  ;;  %s2166_s14 = scalar_lea.hbm %s2391_s26, %s995_s30 }
  0xf5   : > { %p1425_p7 = pneg %p1424_p11  ;;  %p1431_p5 = por %p1430_p10, %p1429_p12 }
  0xf7   : > { %p1432_p9 = pnand %p1431_p5, %p1425_p7 }
  0xf8   : > { %v477_v34 = vld [vmem:[#allocation2] sm:$0xff] }
  0xf9   : > { %v499_v35 = vrot.slane %v477_v34, 1  ;;  %v478_v37 = vld [vmem:[#allocation2 + $0x8] sm:$0x3]  ;;  %1063 = vmatmul.mubr.msk.f32.vlgmr.msra.gmra.mrb[0].mxu0 %vm468_vm1, %v477_v34  ;;  %v656_v49 = vrot.slane %v477_v34, 2 }
  0xfa   : > { %v500_v39 = vrot.slane %v478_v37, 1  ;;  %1110 = vmatpush3.bf16.msra.mxu0 %v1109_v38  ;;  %1081 = vmatprep.mubr.msk.f32.mxu0 %vm1645_vm0, %v1646_v1  ;;  %v657_v51 = vrot.slane %v478_v37, 2 }
  0xfb   : > { %1111 = vmatprep.subr.bf16.mxu0 %v1644_v0 }
  0xfc   : > { %v501_v42 = vsel %vm498_vm3, %v499_v35, %v500_v39  ;;  %v658_v52 = vsel %vm655_vm4, %v656_v49, %v657_v51 }
  0xfd   : > { %1044 = vmatmul.mubr.msk.f32.vlgmr.msra.gmra.mrb[0].mxu1 %vm468_vm1, %v501_v42 }
  0xfe   : > { %1113 = vmatpush3.bf16.msra.mxu0 %v1112_v43 }
  0xff   : > { %1114 = vmatprep.subr.bf16.mxu0 %v1644_v0 }
 0x102   : > { %1116 = vmatpush3.bf16.msra.mxu0 %v1115_v46 }
 0x103   : > { %1117 = vmatprep.subr.bf16.mxu0 %v1644_v0 }
 0x106   : > { %1119 = vmatpush3.bf16.msra.mxu0 %v1118_v50 }
 0x109   : > { %1082 = vmatmul.mubr.msk.f32.vlgmr.msra.gmra.mrb[0].mxu0 %vm468_vm1, %v658_v52 }
 0x1d0   : > { %v570_v53 = vpop.f32.mrb[0].mxu1 }
 0x1d1   : > { %v1045_v54 = vpop.f32.mrb[1].mxu1 }
 0x1dc   : > { %v727_v55 = vpop.f32.mrb[0].mxu0 }
 0x1dd   : > { %v1120_v56 = vadd.f32 %v727_v55, %v570_v53  ;;  %v1083_v57 = vpop.f32.mrb[1].mxu0 }
 0x1df   : > { %v734_v58 = vrot.slane %v1120_v56, 4  ;;  %v741_v59 = vmul.f32 %v1120_v56, %v1120_v56  ;;  %732 = vst [vmem:[%s437_s5] sm:$0xff] %v1120_v56 }
 0x1e0   : > { %1435 = shalt.err (!%p1432_p9)
}
 0x1e1   : > { %s1436_s20 = scalar_lea.hbm %s2166_s14, 128  ;;  %s1440_s21 = scalar_lea.hbm %s2392_s0, 512 }
 0x1e2   : > { %p1437_p13 = scmp.ne.s32.totalorder %s2166_s14, %s1436_s20  ;;  %p1441_p4 = scmp.lt.u32.totalorder %s2166_s14, %s2392_s0 }
 0x1e3   : > { %p1442_p6 = scmp.lt.u32.totalorder %s1440_s21, %s1436_s20  ;;  %p1444_p8 = scmp.lt.u32.totalorder %s1436_s20, %s2166_s14 }
 0x1e4   : > { %p1438_p1 = pnand %p1437_p13, %p2393_p2 }
 0x1e5   : > { %p1443_p0 = por %p1442_p6, %p1441_p4 }
 0x1e6   : > { %p1439_p3 = pneg %p1438_p1 }
 0x1e7   : > { %p1445_p11 = por %p1444_p8, %p1443_p0 }
 0x1e9   : > { %p1446_p7 = pnand %p1445_p11, %p1439_p3 }
 0x1eb   : > { %1449 = shalt.err (!%p1446_p7)
}
 0x1ec   : > { %1133 = dma.vmem_to_hbm [thread:$0]  (%p2393_p2), %s2168_s22, 128, %s2166_s14, %s750_s24   ;;  %v735_v60 = vadd.f32 %v1120_v56, %v734_v58  ;;  %v742_v61 = vrot.slane %v741_v59, 4 }
 0x1ed   : > { %s785_s18 = sshll.u32 %s2127_s16, 4  ;;  %s2394_s8 = sld [smem:[#allocation40_spill]]  ;;  %s2202_s18 = int_to_ptr.vmem [resolvable:$true] %s785_s18 }
 0x1ee   : > { %v736_v62 = vrot.slane %v735_v60, 2  ;;  %v743_v63 = vadd.f32 %v742_v61, %v741_v59  ;;  %s755_s22 = scalar_lea.sflag [#allocation13], %s442_s13  ;;  %s1450_s14 = scalar_lea.vmem %s2202_s18, 128 }
 0x1ef   : > { %p1451_p2 = scmp.ne.s32.totalorder %s2202_s18, %s1450_s14  ;;  %p2396_p12 = scmp.ne.s32.totalorder %s2353_s17, 0 }
 0x1f0   : > { %v737_v0 = vadd.f32 %v736_v62, %v735_v60  ;;  %v744_v1 = vrot.slane %v743_v63, 2  ;;  %s1648_s1 = smov [#allocation12]  }
 0x1f1   : > { %p1452_p10 = pnand %p1451_p2, %p2396_p12  ;;  %s1454_s24 = sshll.u32 %s1648_s1, 4  ;;  %s1455_s24 = int_to_ptr.vmem [resolvable:$false] %s1454_s24 }
 0x1f2   : > { %v738_v2 = vrot.slane %v737_v0, 1  ;;  %v745_v3 = vadd.f32 %v744_v1, %v743_v63  ;;  %p1457_p9 = scmp.lt.s32.totalorder %s2202_s18, %s1455_s24 }
 0x1f3   : > { %s2395_s20 = smov %s2394_s8  ;;  %s2199_s5 = scalar_lea.hbm %s2394_s8, %s995_s30 }
 0x1f4   : > { %v739_v4 = vadd.f32 %v738_v2, %v737_v0  ;;  %v746_v5 = vrot.slane %v745_v3, 1  ;;  %p1453_p5 = pneg %p1452_p10  ;;  %s1456_s30 = scalar_lea.vmem %s1455_s24, 256 }
 0x1f5   : > { %p1458_p13 = scmp.lt.s32.totalorder %s1456_s30, %s1450_s14 }
 0x1f6   : > { %v747_v6 = vadd.f32 %v746_v5, %v745_v3  ;;  %740 = vst [vmem:[%s2127_s16] sm:$0x1] %v739_v4 }
 0x1f7   : > { %p1459_p1 = por %p1458_p13, %p1457_p9 }
 0x1f8   : > { %748 = vst [vmem:[%s2127_s16 + $0x1] sm:$0x1] %v747_v6 }
 0x1f9   : > { %p1460_p3 = pnand %p1459_p1, %p1453_p5 }
 0x1fb   : > { %1463 = shalt.err (!%p1460_p3)
}
 0x1fc   : > { %s1464_s13 = scalar_lea.hbm %s2199_s5, 128  ;;  %s1468_s21 = scalar_lea.hbm %s2395_s20, 512 }
 0x1fd   : > { %p1465_p4 = scmp.ne.s32.totalorder %s2199_s5, %s1464_s13  ;;  %p1469_p8 = scmp.lt.u32.totalorder %s2199_s5, %s2395_s20 }
 0x1fe   : > { %p1470_p11 = scmp.lt.u32.totalorder %s1468_s21, %s1464_s13  ;;  %p1472_p2 = scmp.lt.u32.totalorder %s1464_s13, %s2199_s5 }
 0x1ff   : > { %p1466_p6 = pnand %p1465_p4, %p2396_p12 }
 0x200   : > { %p1471_p7 = por %p1470_p11, %p1469_p8 }
 0x201   : > { %p1467_p0 = pneg %p1466_p6 }
 0x202   : > { %p1473_p10 = por %p1472_p2, %p1471_p7 }
 0x204   : > { %p1474_p5 = pnand %p1473_p10, %p1467_p0 }
 0x206   : > { %1477 = shalt.err (!%p1474_p5)
}
 0x207   : > { %1134 = dma.vmem_to_hbm [thread:$0]  (%p2396_p12), %s2202_s18, 128, %s2199_s5, %s755_s22  }
 0x208 PF: > { %p1161_p9 = scmp.ge.s32.totalorder %s1636_s15, 2  ;;  %s797_s11 = sand.u32 1, %s1596_s28  }
 0x209   : > { %p2397_p13 = scmp.ne.s32.totalorder %s2351_s27, 0  ;;  %s798_s2 = scalar_lea.sflag [#allocation5], %s797_s11 }
 0x20b   : > { %p1152_p1 = pnand %p1161_p9, %p2397_p13 }
 0x20d   : > { %1563 = dma.done.wait (!%p1152_p1), %s798_s2, 128  }
 0x20e   : > { %1565 = vsyncadd (!%p1152_p1), %s798_s2, 4294967168  ;;  %s2398_s8 = sld [smem:[#allocation20_spill]]  ;;  %p2399_p3 = scmp.ne.s32.totalorder %s2354_s19, 0 }
 0x210   : > { %p1155_p4 = pnand %p1161_p9, %p2399_p3 }
 0x214   : > { %s806_s14 = sand.u32 1, %s2398_s8  }
 0x215   : > { %s807_s17 = scalar_lea.sflag [#allocation13], %s806_s14 }
 0x216   : > { %1567 = dma.done.wait (!%p1155_p4), %s807_s17, 128  }
 0x217   : > { %1569 = vsyncadd (!%p1155_p4), %s807_s17, 4294967168  ;;  %s31_s15 = sadd.s32 1, %s1636_s15   ;;  %s2401_s27 = sld [smem:[#allocation21_spill]] }
 0x218   : > { %p2236_p12 = scmp.ge.s32.totalorder %s31_s15, 6   ;;  %s2402_s5 = sld [smem:[#allocation35_spill]] }
 0x219   : > { %s2403_s25 = sld [smem:[#allocation23_spill]]  ;;  %s2404_s26 = sld [smem:[#allocation24_spill]] }
 0x21a   : > { %s2405_s22 = sld [smem:[#allocation25_spill]]  ;;  %s2406_s30 = sld [smem:[#allocation34_spill]] }
 0x21b   : > { %s2407_s11 = sld [smem:[#allocation28_spill]]  ;;  %s2408_s19 = sld [smem:[#allocation29_spill]] }
 0x21c   : > { %s2409_s13 = sld [smem:[#allocation30_spill]]  ;;  %s2410_s14 = sld [smem:[#allocation32_spill]] }
 0x21d   : > { %s2411_s24 = smov %s1576_s4  ;;  %s2412_s4 = smov %s2401_s27 }
 0x21e   : > { %s2413_s27 = smov %s2433_s12  ;;  %s2414_s28 = smov %s1600_s29 }
 0x21f   : > { %s2416_s8 = smov %s1612_s9  ;;  %s2417_s9 = smov %s1616_s10 }
 0x220   : > { %s2415_s29 = smov %s2405_s22  ;;  %s2418_s10 = smov %s1981_s7 }
 0x221   : > { %s2419_s12 = smov %s2408_s19  ;;  %30 = sbr.rel (!%p2236_p12) target bundleno = 23 (0x17), region = 136 }
 0x228   :  { %812 = vsyncpa [#allocation4], 1 }
 0x229   :  { %814 = vsyncpa [#allocation4 + $0x1], 1 }
 0x22a   :  { %815 = vsyncpa [#allocation7], 1 }
 0x22b   :  { %817 = vsyncpa [#allocation7 + $0x1], 1 }
 0x22c   :  { %818 = vsyncpa [#allocation10], 1 }
 0x22d   :  { %819 = vsyncpa [#allocation5], 1 }
 0x22e   :  { %821 = vsyncpa [#allocation5 + $0x1], 1 }
 0x22f   :  { %822 = vsyncpa [#allocation13], 1 }
 0x230   :  { %824 = vsyncpa [#allocation13 + $0x1], 1 }

</bundles_post_ra>
